<compile_context>
chip_gen: v7x
topology: tpu7x:2x2x1
jax: 0.10.0
libtpu: 0.0.40
codegen_flags: <defaults>
</compile_context>

<pallas_src>
import jax
import jax.numpy as jnp
from jax.experimental import pallas as pl
from jax.experimental.pallas import tpu as pltpu


def _linear_relu_kernel(x_ref, w_ref, b_ref, o_ref):
    # y = relu(x @ w + b); one batch tile per grid step, weights resident across steps.
    x = x_ref[...]                 # (TB, Kp)
    w = w_ref[...]                 # (Kp, Np)
    b = b_ref[0:1, :]              # (1, Np) row of the sublane-padded (8, Np) bias block
    y = jnp.dot(x, w, preferred_element_type=jnp.float32) + b
    o_ref[...] = jnp.maximum(y, 0.0).astype(o_ref.dtype)


def _pad_to(n, m):
    return (-n) % m


def wrapped_model_forward(x, w, b, *, batch_tile=128):
    """Pallas forward of the wrapped Linear+ReLU model: relu(x @ w + b).

    Pads batch to a multiple of `batch_tile` and feature dims to multiples of 128
    (lane-dense, unmasked stores), runs a parallel grid over batch tiles, then slices
    the result back to the logical shape.
    """
    B, D_in = x.shape
    assert w.shape[0] == D_in
    D_out = w.shape[1]

    pad_b = _pad_to(B, batch_tile)
    pad_k = _pad_to(D_in, 128)
    pad_n = _pad_to(D_out, 128)

    x_p = jnp.pad(x, ((0, pad_b), (0, pad_k)))
    w_p = jnp.pad(w, ((0, pad_k), (0, pad_n)))
    b_row = jnp.pad(jnp.reshape(b, (1, -1)), ((0, 0), (0, pad_n)))
    b_p = jnp.tile(b_row, (8, 1))              # sublane-friendly (8, Np) block

    Bp, Kp = x_p.shape
    Np = w_p.shape[1]
    grid = (Bp // batch_tile,)

    itemsize = jnp.dtype(x.dtype).itemsize
    cost = pl.CostEstimate(
        flops=2 * Bp * Kp * Np,
        transcendentals=0,
        bytes_accessed=(x_p.size + w_p.size + b_p.size + Bp * Np) * itemsize,
    )

    out_p = pl.pallas_call(
        _linear_relu_kernel,
        out_shape=jax.ShapeDtypeStruct((Bp, Np), x.dtype),
        grid=grid,
        in_specs=[
            pl.BlockSpec((batch_tile, Kp), lambda i: (i, 0)),  # batch tile marches
            pl.BlockSpec((Kp, Np), lambda i: (0, 0)),          # weights resident
            pl.BlockSpec((8, Np), lambda i: (0, 0)),           # bias resident
        ],
        out_specs=pl.BlockSpec((batch_tile, Np), lambda i: (i, 0)),
        compiler_params=pltpu.CompilerParams(
            dimension_semantics=("parallel",),                 # shard batch tiles across v7x TCs
        ),
        cost_estimate=cost,
    )(x_p, w_p, b_p)

    return out_p[:B, :D_out]


class ModelWrapper:
    """JAX analogue of the PyTorch ModelWrapper: forward(X) == self.model(X)."""

    def __init__(self, model_fn):
        self.model = model_fn

    def forward(self, X):
        return self.model(X)

    def __call__(self, X):
        return self.forward(X)

    def wrapped_model(self):
        return self.model


if __name__ == "__main__":
    key = jax.random.PRNGKey(0)
    kx, kw, kb, kx2, kw2, kb2 = jax.random.split(key, 6)

    # --- main, hardware-aligned case: lane-dense features, parallel batch grid ---
    batch, hidden = 256, 128
    x = jax.random.normal(kx, (batch, hidden), dtype=jnp.float32)
    w = jax.random.normal(kw, (hidden, hidden), dtype=jnp.float32) * 0.1
    b = jax.random.normal(kb, (hidden,), dtype=jnp.float32) * 0.1

    inner_model = lambda X: wrapped_model_forward(X, w, b)
    wrapper = ModelWrapper(inner_model)

    out = wrapper(x)
    jax.block_until_ready(out)

    ref = jnp.maximum(x @ w + b[None, :], 0.0)
    assert out.shape == (batch, hidden)
    assert jnp.allclose(out, ref, atol=1e-5, rtol=1e-5)

    # --- unaligned case (original tiny shapes) through the same padded kernel path ---
    b2_dim, h2 = 8, 32
    x2 = jax.random.normal(kx2, (b2_dim, h2), dtype=jnp.float32)
    w2 = jax.random.normal(kw2, (h2, h2), dtype=jnp.float32) * 0.1
    b2 = jax.random.normal(kb2, (h2,), dtype=jnp.float32) * 0.1

    out2 = ModelWrapper(lambda X: wrapped_model_forward(X, w2, b2))(x2)
    jax.block_until_ready(out2)
    ref2 = jnp.maximum(x2 @ w2 + b2[None, :], 0.0)
    assert out2.shape == (b2_dim, h2)
    assert jnp.allclose(out2, ref2, atol=1e-5, rtol=1e-5)

    print("KERNEL_OK")
</pallas_src>

<mosaic_0001>
module attributes {stable_mosaic.version = 11 : i64} {
  func.func @_linear_relu_kernel(%arg0: i32, %arg1: memref<128x128xf32, #tpu.memory_space<vmem>>, %arg2: memref<128x128xf32, #tpu.memory_space<vmem>>, %arg3: memref<8x128xf32, #tpu.memory_space<vmem>>, %arg4: memref<128x128xf32, #tpu.memory_space<vmem>>) attributes {dimension_semantics = [#tpu.dimension_semantics<parallel>], iteration_bounds = array<i64: 2>, scalar_prefetch = 0 : i64, scratch_operands = 0 : i64, tpu.core_type = #tpu.core_type<tc>, window_params = [{transform_indices = @transform_0, window_bounds = array<i64: 128, 128>}, {pipeline_mode = #tpu.pipeline_mode<synchronous>, transform_indices = @transform_1, window_bounds = array<i64: 128, 128>}, {pipeline_mode = #tpu.pipeline_mode<synchronous>, transform_indices = @transform_2, window_bounds = array<i64: 8, 128>}, {transform_indices = @transform_3, window_bounds = array<i64: 128, 128>}]} {
    %c0 = arith.constant 0 : index
    %c0_0 = arith.constant 0 : index
    %0 = vector.load %arg1[%c0, %c0_0] : memref<128x128xf32, #tpu.memory_space<vmem>>, vector<128x128xf32>
    %c0_1 = arith.constant 0 : index
    %c0_2 = arith.constant 0 : index
    %1 = vector.load %arg2[%c0_1, %c0_2] : memref<128x128xf32, #tpu.memory_space<vmem>>, vector<128x128xf32>
    %c0_3 = arith.constant 0 : index
    %c0_4 = arith.constant 0 : index
    %2 = vector.load %arg3[%c0_3, %c0_4] : memref<8x128xf32, #tpu.memory_space<vmem>>, vector<1x128xf32>
    %cst = arith.constant dense<0.000000e+00> : vector<128x128xf32>
    %3 = tpu.matmul %0, %1, %cst {dimension_numbers = #tpu.dot_dimension_numbers<[1], [0], [0], [1], [0, 0, 1, 1], [], []>} : vector<128x128xf32>, vector<128x128xf32>, vector<128x128xf32> -> vector<128x128xf32>
    %4 = vector.broadcast %2 : vector<1x128xf32> to vector<128x128xf32>
    %5 = arith.addf %3, %4 : vector<128x128xf32>
    %cst_5 = arith.constant 0.000000e+00 : f32
    %6 = vector.broadcast %cst_5 : f32 to vector<128x128xf32>
    %7 = arith.maximumf %5, %6 : vector<128x128xf32>
    %c0_6 = arith.constant 0 : index
    %c0_7 = arith.constant 0 : index
    %8 = vector.load %arg4[%c0_6, %c0_7] : memref<128x128xf32, #tpu.memory_space<vmem>>, vector<128x128xf32>
    tpu.vector_store %arg4[%c0_6, %c0_7], %7 {strides = array<i32>} : memref<128x128xf32, #tpu.memory_space<vmem>>, vector<128x128xf32>,
    return
  }
  func.func @transform_0(%arg0: i32) -> (i32, i32) {
    %c0_i32 = arith.constant 0 : i32
    %c0_i32_0 = arith.constant 0 : i32
    return %arg0, %c0_i32 : i32, i32
  }
  func.func @transform_1(%arg0: i32) -> (i32, i32) {
    %c0_i32 = arith.constant 0 : i32
    %c0_i32_0 = arith.constant 0 : i32
    %c0_i32_1 = arith.constant 0 : i32
    return %c0_i32, %c0_i32_0 : i32, i32
  }
  func.func @transform_2(%arg0: i32) -> (i32, i32) {
    %c0_i32 = arith.constant 0 : i32
    %c0_i32_0 = arith.constant 0 : i32
    %c0_i32_1 = arith.constant 0 : i32
    return %c0_i32, %c0_i32_0 : i32, i32
  }
  func.func @transform_3(%arg0: i32) -> (i32, i32) {
    %c0_i32 = arith.constant 0 : i32
    %c0_i32_0 = arith.constant 0 : i32
    return %arg0, %c0_i32 : i32, i32
  }
}

</mosaic_0001>

<bundles_post_ra>
// kernel: tpu_custom_call.1
= control target key start
LH: loop header
LB: loop body
LE: loop exit
PB: predicated region body
PF: predicated region fallthrough
CT: control target
= control target key end

     0   :  { %8 = vsyncpa [#allocation3], 0  ;;  %s1233_s0 = inlined_call_operand.hbm [shape: f32[256,128], index: 0, kind: input, shape index: {}]   ;;  %s1234_s1 = inlined_call_operand.hbm [shape: f32[128,128], index: 1, kind: input, shape index: {}]   ;;  %s1235_s2 = inlined_call_operand.hbm [shape: f32[8,128], index: 2, kind: input, shape index: {}]   ;;  %s1236_s3 = inlined_call_operand.hbm [shape: f32[256,128], index: 3, kind: output, shape index: {}]  }
   0x1   :  { %10 = vsyncpa [#allocation3 + $0x1], 0 }
   0x2   :  { %11 = vsyncpa [#allocation6], 0 }
   0x3   :  { %12 = vsyncpa [#allocation4], 0 }
   0x4   :  { %14 = vsyncpa [#allocation4 + $0x1], 0  ;;  %s952_s12 = smov 0   ;;  %s954_s13 = smov 0  }
   0x5   :  { %s956_s14 = smov 0   ;;  %s958_s15 = smov 0  }
   0x6 LB: > { %s973_s16 = sadd.s32 4294967295, %s922_s15   ;;  %s538_s17 = sadd.s32 4294967294, %s922_s15   ;;  %s922_s15 = sphi %s958_s15, %s1256_s15   ;;  %s918_s14 = sphi %s956_s14, %s1255_s14   ;;  %s914_s13 = sphi %s954_s13, %s1254_s13   ;;  %s910_s12 = sphi %s952_s12, %s1253_s12  }
   0x7   : > { %p40_p0 = scmp.ne.s32.totalorder %s914_s13, %s910_s12  ;;  %p1237_p1 = scmp.eq.s32.totalorder %s973_s16, 0 }
   0x8   : > { %p112_p3 = scmp.eq.s32.totalorder %s538_s17, 1  ;;  %p539_p5 = scmp.ge.s32.totalorder %s922_s15, 1 }
   0x9   : > { %p982_p4 = por %p1237_p1, %p40_p0  ;;  %p119_p7 = scmp.lt.s32.totalorder %s922_s15, 3 }
   0xa   : > { %p987_p6 = por %p112_p3, %p40_p0  ;;  %s924_s21 = smov [#allocation5]  }
   0xb   : > { %s1240_s18 = scalar_select %p982_p4, 1, 0 }
   0xc   : > { %s1241_s19 = scalar_select %p987_p6, 1, 0 }
   0xd   : > { %p992_p8 = pnand %p539_p5, %p119_p7  ;;  %s131_s22 = sshll.u32 %s924_s21, 4  ;;  %s996_s22 = int_to_ptr.vmem [resolvable:$true] %s131_s22 }
   0xe   : > { %s925_s24 = smov [#allocation7]   ;;  %s766_s28 = scalar_lea.hbm %s1234_s1, 2048 }
   0xf   : > { %p707_p9 = pneg %p992_p8  ;;  %s145_s25 = sshll.u32 %s925_s24, 4  ;;  %s1007_s25 = int_to_ptr.vmem [resolvable:$true] %s145_s25 }
  0x10   : > { %p767_p12 = scmp.ne.s32.totalorder %s1234_s1, %s766_s28  ;;  %p773_p5 = scmp.lt.u32.totalorder %s766_s28, %s1234_s1 }
  0x11   : > { %p1003_p11 = pnand %p707_p9, %p1237_p1 }
  0x13   : > { %p768_p13 = pneg %p1003_p11 }
  0x15   : > { %p769_p0 = pnand %p768_p13, %p767_p12 }
  0x17   : > { %p770_p3 = pneg %p769_p0 }
  0x19   : > { %p775_p7 = pnand %p773_p5, %p770_p3 }
  0x1b   : > { %778 = shalt.err (!%p775_p7)
}
  0x1c   : > { %s779_s6 = scalar_lea.vmem %s996_s22, 2048  ;;  %p787_p2 = scmp.lt.s32.totalorder %s996_s22, %s996_s22 }
  0x1d   : > { %p780_p9 = scmp.ne.s32.totalorder %s996_s22, %s779_s6  ;;  %p788_p12 = scmp.lt.s32.totalorder %s779_s6, %s779_s6 }
  0x1f   : > { %p782_p10 = pnand %p780_p9, %p768_p13  ;;  %p789_p0 = por %p788_p12, %p787_p2 }
  0x21   : > { %p783_p1 = pneg %p782_p10 }
  0x23   : > { %p790_p6 = pnand %p789_p0, %p783_p1 }
  0x25   : > { %793 = shalt.err (!%p790_p6)
}
  0x26   : > { %s926_s7 = smov 128   ;;  %s927_s8 = smov 8  }
  0x27   : > { %710 = dma.hbm_to_vmem [thread:$0]  (!%p1003_p11), %s1234_s1, 2048, %s996_s22, [#allocation6], %s926_s7, %s926_s7, %s927_s8  }
  0x28   : > { %s794_s21 = scalar_lea.hbm %s1235_s2, 128 }
  0x29   : > { %p795_p1 = scmp.ne.s32.totalorder %s1235_s2, %s794_s21  ;;  %p801_p10 = scmp.lt.u32.totalorder %s794_s21, %s1235_s2 }
  0x2b   : > { %p797_p2 = pnand %p795_p1, %p768_p13 }
  0x2d   : > { %p798_p6 = pneg %p797_p2 }
  0x2f   : > { %p803_p3 = pnand %p801_p10, %p798_p6 }
  0x31   : > { %806 = shalt.err (!%p803_p3)
}
  0x32   : > { %s807_s22 = scalar_lea.vmem %s1007_s25, 128  ;;  %p815_p12 = scmp.lt.s32.totalorder %s1007_s25, %s1007_s25 }
  0x33   : > { %p808_p5 = scmp.ne.s32.totalorder %s1007_s25, %s807_s22  ;;  %p816_p0 = scmp.lt.s32.totalorder %s807_s22, %s807_s22 }
  0x35   : > { %p810_p7 = pnand %p808_p5, %p768_p13  ;;  %p817_p1 = por %p816_p0, %p815_p12 }
  0x37   : > { %p811_p9 = pneg %p810_p7 }
  0x39   : > { %p818_p2 = pnand %p817_p1, %p811_p9 }
  0x3b   : > { %821 = shalt.err (!%p818_p2)
}
  0x3c   : > { %713 = dma.hbm_to_vmem [thread:$0]  (!%p1003_p11), %s1235_s2, 128, %s1007_s25, [#allocation6]  }
  0x3d   : > { %s1065_s4 = sadd.s32 1, %s922_s15   ;;  %s27_s23 = sadd.s32 1, %s918_s14 }
  0x3e   : > { %s24_s5 = ssub.s32 %s922_s15, %s1065_s4  ;;  %p34_p13 = scmp.ne.s32.totalorder %s918_s14, %s914_s13 }
  0x3f   : > { %p25_p6 = scmp.eq.s32.totalorder %s24_s5, 0  ;;  %p35_p10 = scmp.eq.s32.totalorder %s922_s15, 0 }
  0x40   : > { %p1244_p3 = scmp.eq.s32.totalorder %s973_s16, 1  ;;  %p724_p7 = scmp.lt.s32.totalorder %s922_s15, 2 }
  0x41   : > { %s1081_s9 = scalar_select %p25_p6, %s918_s14, %s27_s23  }
  0x42   : > { %p1075_p5 = por %p1244_p3, %p34_p13  ;;  %p36_p9 = por %p35_p10, %p34_p13 }
  0x43   : > { %s156_s10 = sand.u32 1, %s918_s14   ;;  %s557_s25 = sshll.u32 %s922_s15, 11 }
  0x44   : > { %s1245_s6 = scalar_select %p1075_p5, 1, 0 }
  0x45   : > { %s543_s11 = sshll.u32 %s156_s10, 7  ;;  %s1088_s24 = scalar_lea.hbm %s1233_s0, %s557_s25 }
  0x46   : > { %s160_s26 = scalar_lea.vmem [#allocation2], %s543_s11  ;;  %p1092_p11 = pnand %p724_p7, %p36_p9 }
  0x47   : > { %s167_s27 = sshll.u32 %s160_s26, 4  ;;  %s1096_s22 = scalar_lea.sflag [#allocation3], %s156_s10  ;;  %s1090_s27 = int_to_ptr.vmem [resolvable:$true] %s167_s27 }
  0x48   : > { %s822_s29 = scalar_lea.hbm %s1088_s24, 2048  ;;  %p824_p0 = pneg %p1092_p11 }
  0x49   : > { %p823_p12 = scmp.ne.s32.totalorder %s1088_s24, %s822_s29  ;;  %s827_s5 = scalar_lea.hbm %s1233_s0, 4096 }
  0x4a   : > { %p828_p13 = scmp.lt.u32.totalorder %s1088_s24, %s1233_s0  ;;  %p829_p6 = scmp.lt.u32.totalorder %s827_s5, %s822_s29 }
  0x4b   : > { %p825_p1 = pnand %p824_p0, %p823_p12  ;;  %p831_p3 = scmp.lt.u32.totalorder %s822_s29, %s1088_s24 }
  0x4c   : > { %p830_p10 = por %p829_p6, %p828_p13 }
  0x4d   : > { %p826_p2 = pneg %p825_p1 }
  0x4e   : > { %p832_p7 = por %p831_p3, %p830_p10 }
  0x50   : > { %p833_p9 = pnand %p832_p7, %p826_p2 }
  0x52   : > { %836 = shalt.err (!%p833_p9)
}
  0x53   : > { %s837_s10 = scalar_lea.vmem %s1090_s27, 2048  ;;  %s928_s17 = smov [#allocation2]  }
  0x54   : > { %p838_p12 = scmp.ne.s32.totalorder %s1090_s27, %s837_s10  ;;  %s842_s21 = sshll.u32 %s928_s17, 4  ;;  %s843_s21 = int_to_ptr.vmem [resolvable:$false] %s842_s21 }
  0x55   : > { %s844_s26 = scalar_lea.vmem %s843_s21, 4096  ;;  %p845_p4 = scmp.lt.s32.totalorder %s1090_s27, %s843_s21 }
  0x56   : > { %p840_p1 = pnand %p838_p12, %p824_p0  ;;  %p846_p13 = scmp.lt.s32.totalorder %s844_s26, %s837_s10 }
  0x58   : > { %p841_p5 = pneg %p840_p1  ;;  %p847_p6 = por %p846_p13, %p845_p4 }
  0x5a   : > { %p848_p10 = pnand %p847_p6, %p841_p5 }
  0x5c   : > { %851 = shalt.err (!%p848_p10)
}
  0x5d   : > { %717 = dma.hbm_to_vmem [thread:$0]  (!%p1092_p11), %s1088_s24, 2048, %s1090_s27, %s1096_s22, %s926_s7, %s926_s7, %s927_s8  }
  0x5e   : > { %179 = sbr.rel (%p992_p8) target bundleno = 384 (0x180), region = 32  ;;  %s1130_s29 = sand.u32 (!%p992_p8), 1, %s914_s13  }
  0x5f   : > { %s547_s30 = sshll.u32 (!%p992_p8), %s1130_s29, 7  ;;  %s182_s23 = scalar_lea.sflag (!%p992_p8), [#allocation3], %s1130_s29 }
  0x60   : > { %s1136_s28 = scalar_lea.vmem (!%p992_p8), [#allocation2], %s547_s30  ;;  %p1247_p4 = scmp.ne.s32.totalorder (!%p992_p8), %s1240_s18, 0 }
  0x65   : > { %897 = dma.done.wait (%p1247_p4), %s182_s23, 2048  }
  0x66   : > { %899 = vsyncadd (%p1247_p4), %s182_s23, 4294965248  ;;  %p1248_p5 = scmp.eq.s32.totalorder %s973_s16, 0 }
  0x68   : > { %901 = dma.done.wait (%p1248_p5), [#allocation6], 2176   ;;  %p1249_p8 = pmov %p1248_p5 }
  0x69   : > { %v234_v0 = vld [vmem:[#allocation5] sm:$0xff]  ;;  %v235_v1 = vld [vmem:[#allocation5 + $0x8] sm:$0xff]  ;;  %v236_v2 = vld [vmem:[#allocation5 + $0x10] sm:$0xff]  ;;  %s1164_s18 = scalar_lea.vmem [#allocation8], %s547_s30  ;;  %s558_s20 = sshll.u32 %s973_s16, 11 }
  0x6a   : > { %903 = vsyncadd (%p1249_p8), [#allocation6], 4294965120  ;;  %v647_v3 = vpack.c.bf16 %v235_v1, %v234_v0  ;;  %v237_v4 = vld [vmem:[#allocation5 + $0x18] sm:$0xff]  ;;  %v238_v6 = vld [vmem:[#allocation5 + $0x20] sm:$0xff]  ;;  %s446_s7 = sshll.u32 %s1164_s18, 4  ;;  %s1183_s24 = scalar_lea.hbm %s1236_s3, %s558_s20  ;;  %s1185_s7 = int_to_ptr.vmem [resolvable:$true] %s446_s7 }
  0x6b   : > { %v651_v5 = vpack.c.bf16 %v237_v4, %v236_v2  ;;  %v239_v7 = vld [vmem:[#allocation5 + $0x28] sm:$0xff]  ;;  %v218_v9 = vld [vmem:[%s1136_s28] sm:$0xff]  ;;  %v240_v11 = vld [vmem:[#allocation5 + $0x30] sm:$0xff]  ;;  %s433_s27 = scalar_lea.sflag [#allocation4], %s1130_s29  ;;  %s852_s22 = scalar_lea.vmem %s1185_s7, 2048 }
  0x6c   : > { %648 = vmatprep.subr.bf16.mxu0 %v647_v3  ;;  %679 = vmatprep.subr.bf16.mxu1 %v647_v3  ;;  %v655_v8 = vpack.c.bf16 %v239_v7, %v238_v6  ;;  %v226_v10 = vld [vmem:[%s1136_s28 + $0x40] sm:$0xff]  ;;  %v241_v12 = vld [vmem:[#allocation5 + $0x38] sm:$0xff]  ;;  %v243_v15 = vld [vmem:[#allocation5 + $0x48] sm:$0xff]  ;;  %p853_p11 = scmp.ne.s32.totalorder %s1185_s7, %s852_s22  ;;  %p1250_p0 = scmp.ne.s32.totalorder %s1245_s6, 0 }
  0x6d   : > { %650 = vmatpush3.bf16.msra.mxu0 %v647_v3  ;;  %687 = vmatpush3.bf16.msra.mxu1 %v647_v3  ;;  %v659_v13 = vpack.c.bf16 %v241_v12, %v240_v11  ;;  %v242_v14 = vld [vmem:[#allocation5 + $0x40] sm:$0xff]  ;;  %v244_v17 = vld [vmem:[#allocation5 + $0x50] sm:$0xff]  ;;  %v245_v18 = vld [vmem:[#allocation5 + $0x58] sm:$0xff]  ;;  %s929_s5 = smov [#allocation8]  }
  0x6e   : > { %652 = vmatprep.subr.bf16.mxu0 %v651_v5  ;;  %680 = vmatprep.subr.bf16.mxu1 %v651_v5  ;;  %v663_v16 = vpack.c.bf16 %v243_v15, %v242_v14  ;;  %v667_v19 = vpack.c.bf16 %v245_v18, %v244_v17  ;;  %v246_v20 = vld [vmem:[#allocation5 + $0x60] sm:$0xff]  ;;  %v247_v21 = vld [vmem:[#allocation5 + $0x68] sm:$0xff]  ;;  %v248_v23 = vld [vmem:[#allocation5 + $0x70] sm:$0xff]  ;;  %p854_p2 = pnand %p853_p11, %p1250_p0  ;;  %s856_s11 = sshll.u32 %s929_s5, 4  ;;  %s857_s11 = int_to_ptr.vmem [resolvable:$false] %s856_s11 }
  0x6f   : > { %623 = vmatprep.mubr.f32.mxu0 %v218_v9  ;;  %635 = vmatprep.mubr.f32.mxu1 %v226_v10  ;;  %v671_v22 = vpack.c.bf16 %v247_v21, %v246_v20  ;;  %v249_v24 = vld [vmem:[#allocation5 + $0x78] sm:$0xff]  ;;  %v219_v26 = vld [vmem:[%s1136_s28 + $0x8] sm:$0xff]  ;;  %v220_v28 = vld [vmem:[%s1136_s28 + $0x10] sm:$0xff]  ;;  %s858_s25 = scalar_lea.vmem %s857_s11, 4096  ;;  %p859_p7 = scmp.lt.s32.totalorder %s1185_s7, %s857_s11 }
  0x70   : > { %v675_v25 = vpack.c.bf16 %v249_v24, %v248_v23  ;;  %v227_v27 = vld [vmem:[%s1136_s28 + $0x48] sm:$0xff]  ;;  %v228_v29 = vld [vmem:[%s1136_s28 + $0x50] sm:$0xff]  ;;  %v221_v30 = vld [vmem:[%s1136_s28 + $0x18] sm:$0xff]  ;;  %p855_p3 = pneg %p854_p2  ;;  %p860_p9 = scmp.lt.s32.totalorder %s858_s25, %s852_s22 }
  0x71   : > { %654 = vmatpush3.bf16.msra.mxu0 %v651_v5  ;;  %688 = vmatpush3.bf16.msra.mxu1 %v651_v5  ;;  %v229_v31 = vld [vmem:[%s1136_s28 + $0x58] sm:$0xff]  ;;  %v222_v32 = vld [vmem:[%s1136_s28 + $0x20] sm:$0xff]  ;;  %v223_v34 = vld [vmem:[%s1136_s28 + $0x28] sm:$0xff] }
  0x72   : > { %656 = vmatprep.subr.bf16.mxu0 %v655_v8  ;;  %681 = vmatprep.subr.bf16.mxu1 %v655_v8  ;;  %v230_v33 = vld [vmem:[%s1136_s28 + $0x60] sm:$0xff]  ;;  %v231_v35 = vld [vmem:[%s1136_s28 + $0x68] sm:$0xff]  ;;  %v224_v36 = vld [vmem:[%s1136_s28 + $0x30] sm:$0xff]  ;;  %p861_p12 = por %p860_p9, %p859_p7 }
  0x73   : > { %v232_v37 = vld [vmem:[%s1136_s28 + $0x70] sm:$0xff]  ;;  %v225_v38 = vld [vmem:[%s1136_s28 + $0x38] sm:$0xff]  ;;  %v551_v40 = vld [vmem:[#allocation7] ss:$0 sm:$0xff] }
  0x74   : > { %v233_v39 = vld [vmem:[%s1136_s28 + $0x78] sm:$0xff]  ;;  %p862_p1 = pnand %p861_p12, %p855_p3 }
  0x75   : > { %658 = vmatpush3.bf16.msra.mxu0 %v655_v8  ;;  %689 = vmatpush3.bf16.msra.mxu1 %v655_v8 }
  0x76   : > { %660 = vmatprep.subr.bf16.mxu0 %v659_v13  ;;  %682 = vmatprep.subr.bf16.mxu1 %v659_v13 }
  0x79   : > { %662 = vmatpush3.bf16.msra.mxu0 %v659_v13  ;;  %690 = vmatpush3.bf16.msra.mxu1 %v659_v13 }
  0x7a   : > { %664 = vmatprep.subr.bf16.mxu0 %v663_v16  ;;  %683 = vmatprep.subr.bf16.mxu1 %v663_v16 }
  0x7d   : > { %666 = vmatpush3.bf16.msra.mxu0 %v663_v16  ;;  %691 = vmatpush3.bf16.msra.mxu1 %v663_v16 }
  0x7e   : > { %668 = vmatprep.subr.bf16.mxu0 %v667_v19  ;;  %684 = vmatprep.subr.bf16.mxu1 %v667_v19 }
  0x81   : > { %670 = vmatpush3.bf16.msra.mxu0 %v667_v19  ;;  %692 = vmatpush3.bf16.msra.mxu1 %v667_v19 }
  0x82   : > { %672 = vmatprep.subr.bf16.mxu0 %v671_v22  ;;  %685 = vmatprep.subr.bf16.mxu1 %v671_v22 }
  0x85   : > { %674 = vmatpush3.bf16.msra.mxu0 %v671_v22  ;;  %693 = vmatpush3.bf16.msra.mxu1 %v671_v22 }
  0x86   : > { %676 = vmatprep.subr.bf16.mxu0 %v675_v25  ;;  %686 = vmatprep.subr.bf16.mxu1 %v675_v25 }
  0x89   : > { %678 = vmatpush3.bf16.msra.mxu0 %v675_v25  ;;  %694 = vmatpush3.bf16.msra.mxu1 %v675_v25 }
  0x8c   : > { %624 = vmatmul.mubr.f32.vlgmr.msra.gmra.mrb[0].mxu0 %v219_v26  ;;  %636 = vmatmul.mubr.f32.vlgmr.msra.gmra.mrb[0].mxu1 %v227_v27 }
  0x8d   : > { %626 = vmatprep.mubr.f32.mxu0 %v220_v28  ;;  %638 = vmatprep.mubr.f32.mxu1 %v228_v29 }
  0x90   : > { %627 = vmatmul.mubr.f32.gmra.mrb[2].mxu0 %v221_v30  ;;  %639 = vmatmul.mubr.f32.gmra.mrb[2].mxu1 %v229_v31 }
  0x91   : > { %629 = vmatprep.mubr.f32.mxu0 %v222_v32  ;;  %641 = vmatprep.mubr.f32.mxu1 %v230_v33 }
  0x94   : > { %630 = vmatmul.mubr.f32.gmra.mrb[4].mxu0 %v223_v34  ;;  %642 = vmatmul.mubr.f32.gmra.mrb[4].mxu1 %v231_v35 }
  0x95   : > { %632 = vmatprep.mubr.f32.mxu0 %v224_v36  ;;  %644 = vmatprep.mubr.f32.mxu1 %v232_v37 }
  0x98   : > { %633 = vmatmul.mubr.f32.gmra.mrb[6].mxu0 %v225_v38  ;;  %645 = vmatmul.mubr.f32.gmra.mrb[6].mxu1 %v233_v39 }
 0x15f   : > { %v625_v41 = vpop.f32.mrb[0].mxu0  ;;  %v637_v42 = vpop.f32.mrb[0].mxu1 }
 0x160   : > { %v327_v43 = vadd.f32 %v625_v41, %v551_v40  ;;  %v367_v44 = vadd.f32 %v637_v42, %v551_v40  ;;  %v321_v45 = vpop.f32.mrb[1].mxu0  ;;  %v361_v46 = vpop.f32.mrb[1].mxu1 }
 0x161   : > { %v322_v47 = vadd.f32 %v551_v40, %v321_v45  ;;  %v362_v48 = vadd.f32 %v551_v40, %v361_v46 }
 0x162   : > { %v401_v49 = vmax.f32 %v327_v43, 0.0  ;;  %v409_v50 = vmax.f32 %v367_v44, 0.0 }
 0x163   : > { %v400_v51 = vmax.f32 %v322_v47, 0.0  ;;  %v408_v52 = vmax.f32 %v362_v48, 0.0  ;;  %v628_v53 = vpop.f32.mrb[2].mxu0  ;;  %v640_v54 = vpop.f32.mrb[2].mxu1 }
 0x164   : > { %417 = vst [vmem:[%s1164_s18 + $0x8] sm:$0xff] %v401_v49  ;;  %425 = vst [vmem:[%s1164_s18 + $0x48] sm:$0xff] %v409_v50  ;;  %v337_v55 = vadd.f32 %v628_v53, %v551_v40  ;;  %v377_v56 = vadd.f32 %v640_v54, %v551_v40  ;;  %v331_v57 = vpop.f32.mrb[3].mxu0  ;;  %v371_v58 = vpop.f32.mrb[3].mxu1 }
 0x165   : > { %416 = vst [vmem:[%s1164_s18] sm:$0xff] %v400_v51  ;;  %424 = vst [vmem:[%s1164_s18 + $0x40] sm:$0xff] %v408_v52  ;;  %v332_v59 = vadd.f32 %v551_v40, %v331_v57  ;;  %v372_v60 = vadd.f32 %v551_v40, %v371_v58 }
 0x166   : > { %v403_v61 = vmax.f32 %v337_v55, 0.0  ;;  %v411_v62 = vmax.f32 %v377_v56, 0.0 }
 0x167   : > { %v402_v63 = vmax.f32 %v332_v59, 0.0  ;;  %v410_v0 = vmax.f32 %v372_v60, 0.0  ;;  %v631_v1 = vpop.f32.mrb[4].mxu0  ;;  %v643_v2 = vpop.f32.mrb[4].mxu1 }
 0x168   : > { %419 = vst [vmem:[%s1164_s18 + $0x18] sm:$0xff] %v403_v61  ;;  %427 = vst [vmem:[%s1164_s18 + $0x58] sm:$0xff] %v411_v62  ;;  %v347_v3 = vadd.f32 %v631_v1, %v551_v40  ;;  %v387_v4 = vadd.f32 %v643_v2, %v551_v40  ;;  %v341_v5 = vpop.f32.mrb[5].mxu0  ;;  %v381_v6 = vpop.f32.mrb[5].mxu1 }
 0x169   : > { %418 = vst [vmem:[%s1164_s18 + $0x10] sm:$0xff] %v402_v63  ;;  %426 = vst [vmem:[%s1164_s18 + $0x50] sm:$0xff] %v410_v0  ;;  %v342_v7 = vadd.f32 %v551_v40, %v341_v5  ;;  %v382_v8 = vadd.f32 %v551_v40, %v381_v6 }
 0x16a   : > { %v405_v9 = vmax.f32 %v347_v3, 0.0  ;;  %v413_v10 = vmax.f32 %v387_v4, 0.0 }
 0x16b   : > { %v404_v11 = vmax.f32 %v342_v7, 0.0  ;;  %v412_v12 = vmax.f32 %v382_v8, 0.0  ;;  %v634_v13 = vpop.f32.mrb[6].mxu0  ;;  %v646_v14 = vpop.f32.mrb[6].mxu1 }
 0x16c   : > { %421 = vst [vmem:[%s1164_s18 + $0x28] sm:$0xff] %v405_v9  ;;  %429 = vst [vmem:[%s1164_s18 + $0x68] sm:$0xff] %v413_v10  ;;  %v357_v15 = vadd.f32 %v634_v13, %v551_v40  ;;  %v397_v16 = vadd.f32 %v646_v14, %v551_v40  ;;  %v351_v17 = vpop.f32.mrb[7].mxu0  ;;  %v391_v18 = vpop.f32.mrb[7].mxu1 }
 0x16d   : > { %420 = vst [vmem:[%s1164_s18 + $0x20] sm:$0xff] %v404_v11  ;;  %428 = vst [vmem:[%s1164_s18 + $0x60] sm:$0xff] %v412_v12  ;;  %v352_v19 = vadd.f32 %v551_v40, %v351_v17  ;;  %v392_v20 = vadd.f32 %v551_v40, %v391_v18 }
 0x16e   : > { %v407_v21 = vmax.f32 %v357_v15, 0.0  ;;  %v415_v22 = vmax.f32 %v397_v16, 0.0 }
 0x16f   : > { %v406_v23 = vmax.f32 %v352_v19, 0.0  ;;  %v414_v24 = vmax.f32 %v392_v20, 0.0 }
 0x170   : > { %423 = vst [vmem:[%s1164_s18 + $0x38] sm:$0xff] %v407_v21  ;;  %431 = vst [vmem:[%s1164_s18 + $0x78] sm:$0xff] %v415_v22 }
 0x171   : > { %422 = vst [vmem:[%s1164_s18 + $0x30] sm:$0xff] %v406_v23  ;;  %430 = vst [vmem:[%s1164_s18 + $0x70] sm:$0xff] %v414_v24 }
 0x172   : > { %865 = shalt.err (!%p862_p1)
}
 0x173   : > { %s866_s10 = scalar_lea.hbm %s1183_s24, 2048  ;;  %s870_s26 = scalar_lea.hbm %s1236_s3, 4096 }
 0x174   : > { %p867_p13 = scmp.ne.s32.totalorder %s1183_s24, %s866_s10  ;;  %p871_p4 = scmp.lt.u32.totalorder %s1183_s24, %s1236_s3 }
 0x175   : > { %p872_p5 = scmp.lt.u32.totalorder %s870_s26, %s866_s10  ;;  %p874_p11 = scmp.lt.u32.totalorder %s866_s10, %s1183_s24 }
 0x176   : > { %p868_p6 = pnand %p867_p13, %p1250_p0 }
 0x177   : > { %p873_p8 = por %p872_p5, %p871_p4 }
 0x178   : > { %p869_p10 = pneg %p868_p6 }
 0x179   : > { %p875_p2 = por %p874_p11, %p873_p8 }
 0x17b   : > { %p876_p3 = pnand %p875_p2, %p869_p10 }
 0x17d   : > { %879 = shalt.err (!%p876_p3)
}
 0x17e   : > { %s930_s28 = smov 128   ;;  %s931_s18 = smov 8  }
 0x17f   : > { %705 = dma.vmem_to_hbm [thread:$0]  (%p1250_p0), %s1185_s7, 2048, %s1183_s24, %s433_s27, %s930_s28, %s930_s28, %s931_s18  }
 0x180 PF: > { %s461_s20 = sand.u32 1, %s910_s12   ;;  %p1251_p7 = scmp.ne.s32.totalorder %s1241_s19, 0 }
 0x181   : > { %p1252_p9 = scmp.ge.s32.totalorder %s922_s15, 2  ;;  %s462_s16 = scalar_lea.sflag [#allocation4], %s461_s20 }
 0x183   : > { %p719_p12 = pnand %p1252_p9, %p1251_p7 }
 0x185   : > { %905 = dma.done.wait (!%p719_p12), %s462_s16, 2048  }
 0x186   : > { %907 = vsyncadd (!%p719_p12), %s462_s16, 4294965248  ;;  %p17_p1 = scmp.ge.s32.totalorder %s1065_s4, 4   ;;  %s1253_s12 = smov %s914_s13 }
 0x187   : > { %s1254_s13 = smov %s918_s14  ;;  %s1255_s14 = smov %s1081_s9 }
 0x188   : > { %s1256_s15 = smov %s1065_s4  ;;  %19 = sbr.rel (!%p17_p1) target bundleno = 6 (0x6), region = 85 }
 0x18f   :  { %467 = vsyncpa [#allocation3], 1 }
 0x190   :  { %469 = vsyncpa [#allocation3 + $0x1], 1 }
 0x191   :  { %470 = vsyncpa [#allocation6], 1 }
 0x192   :  { %471 = vsyncpa [#allocation4], 1 }
 0x193   :  { %473 = vsyncpa [#allocation4 + $0x1], 1 }

</bundles_post_ra>
